<compile_context>
chip_gen: v7x
topology: tpu7x:2x2x1
jax: 0.10.0
libtpu: 0.0.40
codegen_flags: <defaults>
</compile_context>

<pallas_src>
import jax
import jax.numpy as jnp
from jax.experimental import pallas as pl
from jax.experimental.pallas import tpu as pltpu

IN_FEATURES = 1280
OUT_FEATURES = 64


def linear_kernel(x_ref, w_ref, b_ref, o_ref):
    """One grid step: y_tile = x_tile @ W_t + b (MXU matmul, f32 accumulate)."""
    # Default MXU precision; set precision=jax.lax.Precision.HIGHEST here if
    # bit-level parity with torch.float32 Linear is required (hidden under DMA).
    o_ref[...] = (
        jnp.dot(x_ref[...], w_ref[...], preferred_element_type=jnp.float32)
        + b_ref[...]
    ).astype(o_ref.dtype)


def _round_up(x, m):
    return ((x + m - 1) // m) * m


def _pick_tm(M, tm_max):
    """Pick the M tile: whole batch if small; else large tiles, megacore-aware."""
    if M <= tm_max:
        return M  # single block equal to the full dim (no (8,128) constraint issue)
    steps_at_max = pl.cdiv(M, tm_max)
    if steps_at_max >= 4:
        # Plenty of grid steps -> both v7x TensorCores stay busy with tm_max tiles.
        return tm_max
    # Few steps: aim for an even number of steps so the "parallel" M axis splits
    # evenly across the two v7x TensorCores (no-op on v5e/v6e, 1 TC/chip).
    pairs = pl.cdiv(steps_at_max, 2)
    tm = _round_up(pl.cdiv(M, 2 * pairs), 256)
    return min(tm, tm_max)


def projection_forward(x, w_t, b, *, tm_max=2048):
    """x: (M, 1280) f32, w_t: (1280, 64), b: (64,) -> (M, 64)."""
    M, K = x.shape
    Kw, N = w_t.shape
    assert K == Kw and K == IN_FEATURES and N == OUT_FEATURES
    b2 = b.reshape(1, N)

    tm = _pick_tm(M, tm_max)
    grid_m = pl.cdiv(M, tm)  # ragged last block is masked by Pallas (no jnp.pad)

    itemsize = jnp.dtype(x.dtype).itemsize
    # Double-buffered x and out tiles + resident weight/bias, plus headroom.
    vmem_bytes = (
        2 * tm * K * itemsize        # x double-buffer
        + 2 * tm * N * itemsize      # out double-buffer
        + 2 * K * N * itemsize       # weight (resident, constant index_map)
        + 2 * 8 * 128 * itemsize     # bias tile (padded to (8,128))
    )
    vmem_limit = int(vmem_bytes) + (8 << 20)

    return pl.pallas_call(
        linear_kernel,
        out_shape=jax.ShapeDtypeStruct((M, N), x.dtype),
        grid_spec=pltpu.PrefetchScalarGridSpec(
            num_scalar_prefetch=0,
            grid=(grid_m,),
            in_specs=[
                pl.BlockSpec((tm, K), lambda i: (i, 0)),   # x tile (streams)
                pl.BlockSpec((K, N), lambda i: (0, 0)),    # W_t (resident, 1 DMA)
                pl.BlockSpec((1, N), lambda i: (0, 0)),    # bias (resident)
            ],
            out_specs=pl.BlockSpec((tm, N), lambda i: (i, 0)),
        ),
        compiler_params=pltpu.CompilerParams(
            # M rows are independent -> shard grid steps across v7x TensorCores.
            dimension_semantics=("parallel",),
            vmem_limit_bytes=vmem_limit,
        ),
    )(x, w_t, b2)


if __name__ == "__main__":
    key = jax.random.PRNGKey(0)
    kx, kw, kb, kx2 = jax.random.split(key, 4)

    BATCH = 8  # small batch, multiple of 8 sublanes

    # Deterministic parameter init (same shapes as nn.Linear(1280, 64)).
    bound = 1.0 / jnp.sqrt(IN_FEATURES)
    w = jax.random.uniform(
        kw, (OUT_FEATURES, IN_FEATURES), jnp.float32, -bound, bound
    )
    b = jax.random.uniform(kb, (OUT_FEATURES,), jnp.float32, -bound, bound)
    w_t = w.T  # (1280, 64), K-major for the kernel

    # --- main check: small batch, single block ---
    x = jax.random.normal(kx, (BATCH, IN_FEATURES), jnp.float32)
    y = jax.block_until_ready(projection_forward(x, w_t, b))
    y_ref = x @ w.T + b
    assert y.shape == (BATCH, OUT_FEATURES)
    assert jnp.allclose(y, y_ref, atol=1e-4, rtol=1e-4)

    # --- ragged-grid check: M not a multiple of tm exercises the masked
    #     last block (replaces the old jnp.pad path) at a small shape ---
    M2 = 20
    x2 = jax.random.normal(kx2, (M2, IN_FEATURES), jnp.float32)
    y2 = jax.block_until_ready(projection_forward(x2, w_t, b, tm_max=8))
    y2_ref = x2 @ w.T + b
    assert y2.shape == (M2, OUT_FEATURES)
    assert jnp.allclose(y2, y2_ref, atol=1e-4, rtol=1e-4)

    print("KERNEL_OK")
</pallas_src>

<mosaic_0001>
module attributes {stable_mosaic.version = 11 : i64} {
  func.func @linear_kernel(%arg0: i32, %arg1: memref<8x1280xf32, #tpu.memory_space<vmem>>, %arg2: memref<1280x64xf32, #tpu.memory_space<vmem>>, %arg3: memref<1x64xf32, #tpu.memory_space<vmem>>, %arg4: memref<8x64xf32, #tpu.memory_space<vmem>>) attributes {dimension_semantics = [#tpu.dimension_semantics<parallel>], iteration_bounds = array<i64: 1>, scalar_prefetch = 0 : i64, scratch_operands = 0 : i64, tpu.core_type = #tpu.core_type<tc>, window_params = [{transform_indices = @transform_0, window_bounds = array<i64: 8, 1280>}, {pipeline_mode = #tpu.pipeline_mode<synchronous>, transform_indices = @transform_1, window_bounds = array<i64: 1280, 64>}, {pipeline_mode = #tpu.pipeline_mode<synchronous>, transform_indices = @transform_2, window_bounds = array<i64: 1, 64>}, {transform_indices = @transform_3, window_bounds = array<i64: 8, 64>}]} {
    %c0 = arith.constant 0 : index
    %c0_0 = arith.constant 0 : index
    %0 = vector.load %arg1[%c0, %c0_0] : memref<8x1280xf32, #tpu.memory_space<vmem>>, vector<8x1280xf32>
    %c0_1 = arith.constant 0 : index
    %c0_2 = arith.constant 0 : index
    %1 = vector.load %arg2[%c0_1, %c0_2] : memref<1280x64xf32, #tpu.memory_space<vmem>>, vector<1280x64xf32>
    %cst = arith.constant dense<0.000000e+00> : vector<8x64xf32>
    %2 = tpu.matmul %0, %1, %cst {dimension_numbers = #tpu.dot_dimension_numbers<[1], [0], [0], [1], [0, 0, 1, 1], [], []>} : vector<8x1280xf32>, vector<1280x64xf32>, vector<8x64xf32> -> vector<8x64xf32>
    %c0_3 = arith.constant 0 : index
    %c0_4 = arith.constant 0 : index
    %3 = vector.load %arg3[%c0_3, %c0_4] : memref<1x64xf32, #tpu.memory_space<vmem>>, vector<1x64xf32>
    %4 = vector.broadcast %3 : vector<1x64xf32> to vector<8x64xf32>
    %5 = arith.addf %2, %4 : vector<8x64xf32>
    %c0_5 = arith.constant 0 : index
    %c0_6 = arith.constant 0 : index
    %6 = vector.load %arg4[%c0_5, %c0_6] : memref<8x64xf32, #tpu.memory_space<vmem>>, vector<8x64xf32>
    tpu.vector_store %arg4[%c0_5, %c0_6], %5 {strides = array<i32>} : memref<8x64xf32, #tpu.memory_space<vmem>>, vector<8x64xf32>,
    return
  }
  func.func @transform_0(%arg0: i32) -> (i32, i32) {
    %c0_i32 = arith.constant 0 : i32
    %c0_i32_0 = arith.constant 0 : i32
    return %arg0, %c0_i32 : i32, i32
  }
  func.func @transform_1(%arg0: i32) -> (i32, i32) {
    %c0_i32 = arith.constant 0 : i32
    %c0_i32_0 = arith.constant 0 : i32
    %c0_i32_1 = arith.constant 0 : i32
    return %c0_i32, %c0_i32_0 : i32, i32
  }
  func.func @transform_2(%arg0: i32) -> (i32, i32) {
    %c0_i32 = arith.constant 0 : i32
    %c0_i32_0 = arith.constant 0 : i32
    %c0_i32_1 = arith.constant 0 : i32
    return %c0_i32, %c0_i32_0 : i32, i32
  }
  func.func @transform_3(%arg0: i32) -> (i32, i32) {
    %c0_i32 = arith.constant 0 : i32
    %c0_i32_0 = arith.constant 0 : i32
    return %arg0, %c0_i32 : i32, i32
  }
}

</mosaic_0001>

<bundles_post_ra>
// kernel: tpu_custom_call.1
= control target key start
LH: loop header
LB: loop body
LE: loop exit
PB: predicated region body
PF: predicated region fallthrough
CT: control target
= control target key end

     0   :  { %s1465_s0 = inlined_call_operand.vmem [shape: f32[8,1280], index: 0, kind: input, shape index: {}]   ;;  %s1466_s1 = inlined_call_operand.vmem [shape: f32[1280,64], index: 1, kind: input, shape index: {}]   ;;  %s1467_s2 = inlined_call_operand.vmem [shape: f32[1,64], index: 2, kind: input, shape index: {}]   ;;  %s1468_s3 = inlined_call_operand.hbm [shape: f32[8,64], index: 3, kind: output, shape index: {}]  }
   0x1   :  { %v41_v0 = vld [vmem:[%s1466_s1 + $0x80] sm:$0xff]  ;;  %v42_v1 = vld [vmem:[%s1466_s1 + $0x88] sm:$0xff]  ;;  %v43_v11 = vld [vmem:[%s1466_s1 + $0x90] sm:$0xff] }
   0x2   :  { %v25_v2 = vld [vmem:[%s1466_s1] sm:$0xff]  ;;  %v734_v3 = vpack.c.bf16 %v42_v1, %v41_v0  ;;  %v26_v4 = vld [vmem:[%s1466_s1 + $0x8] sm:$0xff]  ;;  %v44_v13 = vld [vmem:[%s1466_s1 + $0x98] sm:$0xff] }
   0x3   :  { %v73_v5 = vld [vmem:[%s1466_s1 + $0x180] sm:$0xff]  ;;  %v74_v6 = vld [vmem:[%s1466_s1 + $0x188] sm:$0xff]  ;;  %v736_v7 = vpack.c.bf16 %v26_v4, %v25_v2  ;;  %v27_v14 = vld [vmem:[%s1466_s1 + $0x10] sm:$0xff]  ;;  %v738_v16 = vpack.c.bf16 %v44_v13, %v43_v11 }
   0x4   :  { %v766_v8 = vpack.c.bf16 %v74_v6, %v73_v5  ;;  %v57_v9 = vld [vmem:[%s1466_s1 + $0x100] sm:$0xff]  ;;  %v58_v10 = vld [vmem:[%s1466_s1 + $0x108] sm:$0xff]  ;;  %735 = vmatprep.subr.bf16.mxu0 %v734_v3  ;;  %v28_v15 = vld [vmem:[%s1466_s1 + $0x18] sm:$0xff] }
   0x5   :  { %v768_v12 = vpack.c.bf16 %v58_v10, %v57_v9  ;;  %737 = vmatpush3.bf16.msra.mxu0 %v736_v7  ;;  %v740_v17 = vpack.c.bf16 %v28_v15, %v27_v14  ;;  %v75_v18 = vld [vmem:[%s1466_s1 + $0x190] sm:$0xff]  ;;  %v76_v19 = vld [vmem:[%s1466_s1 + $0x198] sm:$0xff]  ;;  %v45_v23 = vld [vmem:[%s1466_s1 + $0xa0] sm:$0xff] }
   0x6   :  { %767 = vmatprep.subr.bf16.mxu1 %v766_v8  ;;  %v59_v20 = vld [vmem:[%s1466_s1 + $0x110] sm:$0xff]  ;;  %v770_v21 = vpack.c.bf16 %v76_v19, %v75_v18  ;;  %v60_v22 = vld [vmem:[%s1466_s1 + $0x118] sm:$0xff]  ;;  %v46_v24 = vld [vmem:[%s1466_s1 + $0xa8] sm:$0xff]  ;;  %739 = vmatprep.subr.bf16.mxu0 %v738_v16 }
   0x7   :  { %769 = vmatpush3.bf16.msra.mxu1 %v768_v12  ;;  %v772_v25 = vpack.c.bf16 %v60_v22, %v59_v20  ;;  %v742_v26 = vpack.c.bf16 %v46_v24, %v45_v23  ;;  %v29_v27 = vld [vmem:[%s1466_s1 + $0x20] sm:$0xff]  ;;  %v30_v28 = vld [vmem:[%s1466_s1 + $0x28] sm:$0xff]  ;;  %v47_v35 = vld [vmem:[%s1466_s1 + $0xb0] sm:$0xff] }
   0x8   :  { %v77_v29 = vld [vmem:[%s1466_s1 + $0x1a0] sm:$0xff]  ;;  %771 = vmatprep.subr.bf16.mxu1 %v770_v21  ;;  %v78_v30 = vld [vmem:[%s1466_s1 + $0x1a8] sm:$0xff]  ;;  %v744_v33 = vpack.c.bf16 %v30_v28, %v29_v27  ;;  %v48_v36 = vld [vmem:[%s1466_s1 + $0xb8] sm:$0xff] }
   0x9   :  { %v61_v31 = vld [vmem:[%s1466_s1 + $0x120] sm:$0xff]  ;;  %v62_v32 = vld [vmem:[%s1466_s1 + $0x128] sm:$0xff]  ;;  %741 = vmatpush3.bf16.msra.mxu0 %v740_v17  ;;  %v774_v34 = vpack.c.bf16 %v78_v30, %v77_v29  ;;  %v31_v37 = vld [vmem:[%s1466_s1 + $0x30] sm:$0xff]  ;;  %v746_v39 = vpack.c.bf16 %v48_v36, %v47_v35 }
   0xa   :  { %743 = vmatprep.subr.bf16.mxu0 %v742_v26  ;;  %v776_v38 = vpack.c.bf16 %v62_v32, %v61_v31  ;;  %v32_v40 = vld [vmem:[%s1466_s1 + $0x38] sm:$0xff]  ;;  %v79_v41 = vld [vmem:[%s1466_s1 + $0x1b0] sm:$0xff]  ;;  %v49_v46 = vld [vmem:[%s1466_s1 + $0xc0] sm:$0xff] }
   0xb   :  { %773 = vmatpush3.bf16.msra.mxu1 %v772_v25  ;;  %v80_v42 = vld [vmem:[%s1466_s1 + $0x1b8] sm:$0xff]  ;;  %v63_v44 = vld [vmem:[%s1466_s1 + $0x130] sm:$0xff]  ;;  %v50_v47 = vld [vmem:[%s1466_s1 + $0xc8] sm:$0xff]  ;;  %v748_v48 = vpack.c.bf16 %v32_v40, %v31_v37 }
   0xc   :  { %775 = vmatprep.subr.bf16.mxu1 %v774_v34  ;;  %v778_v43 = vpack.c.bf16 %v80_v42, %v79_v41  ;;  %v64_v45 = vld [vmem:[%s1466_s1 + $0x138] sm:$0xff]  ;;  %v81_v49 = vld [vmem:[%s1466_s1 + $0x1c0] sm:$0xff]  ;;  %v82_v50 = vld [vmem:[%s1466_s1 + $0x1c8] sm:$0xff]  ;;  %v750_v52 = vpack.c.bf16 %v50_v47, %v49_v46 }
   0xd   :  { %745 = vmatpush3.bf16.msra.mxu0 %v744_v33  ;;  %v780_v51 = vpack.c.bf16 %v64_v45, %v63_v44  ;;  %v33_v53 = vld [vmem:[%s1466_s1 + $0x40] sm:$0xff]  ;;  %v34_v54 = vld [vmem:[%s1466_s1 + $0x48] sm:$0xff]  ;;  %v782_v56 = vpack.c.bf16 %v82_v50, %v81_v49  ;;  %v51_v58 = vld [vmem:[%s1466_s1 + $0xd0] sm:$0xff] }
   0xe   :  { %747 = vmatprep.subr.bf16.mxu0 %v746_v39  ;;  %v65_v55 = vld [vmem:[%s1466_s1 + $0x140] sm:$0xff]  ;;  %v66_v57 = vld [vmem:[%s1466_s1 + $0x148] sm:$0xff]  ;;  %v52_v59 = vld [vmem:[%s1466_s1 + $0xd8] sm:$0xff]  ;;  %v752_v62 = vpack.c.bf16 %v34_v54, %v33_v53 }
   0xf   :  { %777 = vmatpush3.bf16.msra.mxu1 %v776_v38  ;;  %v83_v60 = vld [vmem:[%s1466_s1 + $0x1d0] sm:$0xff]  ;;  %v84_v61 = vld [vmem:[%s1466_s1 + $0x1d8] sm:$0xff]  ;;  %v784_v63 = vpack.c.bf16 %v66_v57, %v65_v55  ;;  %v754_v0 = vpack.c.bf16 %v52_v59, %v51_v58  ;;  %v53_v6 = vld [vmem:[%s1466_s1 + $0xe0] sm:$0xff] }
  0x10   :  { %779 = vmatprep.subr.bf16.mxu1 %v778_v43  ;;  %v35_v1 = vld [vmem:[%s1466_s1 + $0x50] sm:$0xff]  ;;  %v36_v2 = vld [vmem:[%s1466_s1 + $0x58] sm:$0xff]  ;;  %v786_v4 = vpack.c.bf16 %v84_v61, %v83_v60  ;;  %v54_v7 = vld [vmem:[%s1466_s1 + $0xe8] sm:$0xff] }
  0x11   :  { %749 = vmatpush3.bf16.msra.mxu0 %v748_v48  ;;  %v67_v3 = vld [vmem:[%s1466_s1 + $0x150] sm:$0xff]  ;;  %v68_v5 = vld [vmem:[%s1466_s1 + $0x158] sm:$0xff]  ;;  %v85_v8 = vld [vmem:[%s1466_s1 + $0x1e0] sm:$0xff]  ;;  %v756_v10 = vpack.c.bf16 %v36_v2, %v35_v1  ;;  %v758_v14 = vpack.c.bf16 %v54_v7, %v53_v6 }
  0x12   :  { %751 = vmatprep.subr.bf16.mxu0 %v750_v52  ;;  %v86_v9 = vld [vmem:[%s1466_s1 + $0x1e8] sm:$0xff]  ;;  %v37_v11 = vld [vmem:[%s1466_s1 + $0x60] sm:$0xff]  ;;  %v788_v13 = vpack.c.bf16 %v68_v5, %v67_v3  ;;  %v55_v19 = vld [vmem:[%s1466_s1 + $0xf0] sm:$0xff] }
  0x13   :  { %781 = vmatpush3.bf16.msra.mxu1 %v780_v51  ;;  %v16_v12 = vld [vmem:[%s1465_s0 + $0x8] sm:$0xff]  ;;  %v69_v16 = vld [vmem:[%s1466_s1 + $0x160] sm:$0xff]  ;;  %v790_v18 = vpack.c.bf16 %v86_v9, %v85_v8  ;;  %v56_v20 = vld [vmem:[%s1466_s1 + $0xf8] sm:$0xff] }
  0x14   :  { %783 = vmatprep.subr.bf16.mxu1 %v782_v56  ;;  %v38_v15 = vld [vmem:[%s1466_s1 + $0x68] sm:$0xff]  ;;  %256 = vmatprep.mubr.f32.mxu0 %v16_v12  ;;  %v18_v21 = vld [vmem:[%s1465_s0 + $0x18] sm:$0xff]  ;;  %v87_v22 = vld [vmem:[%s1466_s1 + $0x1f0] sm:$0xff]  ;;  %v762_v26 = vpack.c.bf16 %v56_v20, %v55_v19 }
  0x15   :  { %753 = vmatpush3.bf16.msra.mxu0 %v752_v62  ;;  %v70_v17 = vld [vmem:[%s1466_s1 + $0x168] sm:$0xff]  ;;  %v88_v23 = vld [vmem:[%s1466_s1 + $0x1f8] sm:$0xff]  ;;  %326 = vmatprep.mubr.f32.mxu1 %v18_v21  ;;  %v760_v24 = vpack.c.bf16 %v38_v15, %v37_v11  ;;  %v39_v27 = vld [vmem:[%s1466_s1 + $0x70] sm:$0xff] }
  0x16   :  { %755 = vmatprep.subr.bf16.mxu0 %v754_v0  ;;  %v792_v25 = vpack.c.bf16 %v70_v17, %v69_v16  ;;  %v40_v28 = vld [vmem:[%s1466_s1 + $0x78] sm:$0xff]  ;;  %v71_v29 = vld [vmem:[%s1466_s1 + $0x170] sm:$0xff]  ;;  %v794_v30 = vpack.c.bf16 %v88_v23, %v87_v22  ;;  %v105_v32 = vld [vmem:[%s1466_s1 + $0x280] sm:$0xff] }
  0x17   :  { %785 = vmatpush3.bf16.msra.mxu1 %v784_v63  ;;  %v72_v31 = vld [vmem:[%s1466_s1 + $0x178] sm:$0xff]  ;;  %v106_v33 = vld [vmem:[%s1466_s1 + $0x288] sm:$0xff]  ;;  %v137_v34 = vld [vmem:[%s1466_s1 + $0x380] sm:$0xff]  ;;  %v764_v36 = vpack.c.bf16 %v40_v28, %v39_v27 }
  0x18   :  { %787 = vmatprep.subr.bf16.mxu1 %v786_v4  ;;  %v138_v35 = vld [vmem:[%s1466_s1 + $0x388] sm:$0xff]  ;;  %v796_v37 = vpack.c.bf16 %v72_v31, %v71_v29  ;;  %v798_v38 = vpack.c.bf16 %v106_v33, %v105_v32  ;;  %v89_v39 = vld [vmem:[%s1466_s1 + $0x200] sm:$0xff]  ;;  %v107_v44 = vld [vmem:[%s1466_s1 + $0x290] sm:$0xff] }
  0x19   :  { %757 = vmatpush3.bf16.msra.mxu0 %v756_v10  ;;  %v90_v40 = vld [vmem:[%s1466_s1 + $0x208] sm:$0xff]  ;;  %v121_v41 = vld [vmem:[%s1466_s1 + $0x300] sm:$0xff]  ;;  %v830_v42 = vpack.c.bf16 %v138_v35, %v137_v34  ;;  %v108_v45 = vld [vmem:[%s1466_s1 + $0x298] sm:$0xff] }
  0x1a   :  { %759 = vmatprep.subr.bf16.mxu0 %v758_v14  ;;  %v122_v43 = vld [vmem:[%s1466_s1 + $0x308] sm:$0xff]  ;;  %v139_v46 = vld [vmem:[%s1466_s1 + $0x390] sm:$0xff]  ;;  %v140_v47 = vld [vmem:[%s1466_s1 + $0x398] sm:$0xff]  ;;  %v800_v49 = vpack.c.bf16 %v90_v40, %v89_v39  ;;  %v802_v52 = vpack.c.bf16 %v108_v45, %v107_v44 }
  0x1b   :  { %789 = vmatpush3.bf16.msra.mxu1 %v788_v13  ;;  %v15_v48 = vld [vmem:[%s1465_s0] sm:$0xff]  ;;  %v17_v50 = vld [vmem:[%s1465_s0 + $0x10] sm:$0xff]  ;;  %v832_v51 = vpack.c.bf16 %v122_v43, %v121_v41  ;;  %v92_v54 = vld [vmem:[%s1466_s1 + $0x218] sm:$0xff]  ;;  %v834_v56 = vpack.c.bf16 %v140_v47, %v139_v46 }
  0x1c   :  { %791 = vmatprep.subr.bf16.mxu1 %v790_v18  ;;  %v91_v53 = vld [vmem:[%s1466_s1 + $0x210] sm:$0xff]  ;;  %v124_v57 = vld [vmem:[%s1466_s1 + $0x318] sm:$0xff]  ;;  %v109_v58 = vld [vmem:[%s1466_s1 + $0x2a0] sm:$0xff] }
  0x1d   :  { %761 = vmatpush3.bf16.msra.mxu0 %v760_v24  ;;  %v123_v55 = vld [vmem:[%s1466_s1 + $0x310] sm:$0xff]  ;;  %v110_v59 = vld [vmem:[%s1466_s1 + $0x2a8] sm:$0xff]  ;;  %v141_v60 = vld [vmem:[%s1466_s1 + $0x3a0] sm:$0xff]  ;;  %v804_v62 = vpack.c.bf16 %v92_v54, %v91_v53 }
  0x1e   :  { %763 = vmatprep.subr.bf16.mxu0 %v762_v26  ;;  %v142_v61 = vld [vmem:[%s1466_s1 + $0x3a8] sm:$0xff]  ;;  %v836_v63 = vpack.c.bf16 %v124_v57, %v123_v55  ;;  %v806_v0 = vpack.c.bf16 %v110_v59, %v109_v58  ;;  %v93_v1 = vld [vmem:[%s1466_s1 + $0x220] sm:$0xff]  ;;  %v111_v6 = vld [vmem:[%s1466_s1 + $0x2b0] sm:$0xff] }
  0x1f   :  { %793 = vmatpush3.bf16.msra.mxu1 %v792_v25  ;;  %v94_v2 = vld [vmem:[%s1466_s1 + $0x228] sm:$0xff]  ;;  %v125_v3 = vld [vmem:[%s1466_s1 + $0x320] sm:$0xff]  ;;  %v838_v4 = vpack.c.bf16 %v142_v61, %v141_v60  ;;  %v112_v7 = vld [vmem:[%s1466_s1 + $0x2b8] sm:$0xff] }
  0x20   :  { %795 = vmatprep.subr.bf16.mxu1 %v794_v30  ;;  %v126_v5 = vld [vmem:[%s1466_s1 + $0x328] sm:$0xff]  ;;  %v143_v8 = vld [vmem:[%s1466_s1 + $0x3b0] sm:$0xff]  ;;  %v144_v9 = vld [vmem:[%s1466_s1 + $0x3b8] sm:$0xff]  ;;  %v808_v10 = vpack.c.bf16 %v94_v2, %v93_v1  ;;  %v810_v12 = vpack.c.bf16 %v112_v7, %v111_v6 }
  0x21   :  { %765 = vmatpush3.bf16.msra.mxu0 %v764_v36  ;;  %v840_v11 = vpack.c.bf16 %v126_v5, %v125_v3  ;;  %v95_v13 = vld [vmem:[%s1466_s1 + $0x230] sm:$0xff]  ;;  %v96_v14 = vld [vmem:[%s1466_s1 + $0x238] sm:$0xff]  ;;  %v842_v16 = vpack.c.bf16 %v144_v9, %v143_v8  ;;  %v113_v18 = vld [vmem:[%s1466_s1 + $0x2c0] sm:$0xff] }
  0x22   :  { %799 = vmatprep.subr.bf16.mxu0 %v798_v38  ;;  %v127_v15 = vld [vmem:[%s1466_s1 + $0x330] sm:$0xff]  ;;  %v128_v17 = vld [vmem:[%s1466_s1 + $0x338] sm:$0xff]  ;;  %v114_v19 = vld [vmem:[%s1466_s1 + $0x2c8] sm:$0xff]  ;;  %v812_v23 = vpack.c.bf16 %v96_v14, %v95_v13 }
  0x23   :  { %797 = vmatpush3.bf16.msra.mxu1 %v796_v37  ;;  %v145_v20 = vld [vmem:[%s1466_s1 + $0x3c0] sm:$0xff]  ;;  %v146_v21 = vld [vmem:[%s1466_s1 + $0x3c8] sm:$0xff]  ;;  %v844_v25 = vpack.c.bf16 %v128_v17, %v127_v15  ;;  %v814_v26 = vpack.c.bf16 %v114_v19, %v113_v18  ;;  %v22_v29 = vld [vmem:[%s1465_s0 + $0x38] sm:$0xff] }
  0x24   :  { %831 = vmatprep.subr.bf16.mxu1 %v830_v42  ;;  %257 = vmatmul.mubr.f32.vlgmr.msra.gmra.mrb[0].mxu0 %v15_v48  ;;  %v20_v22 = vld [vmem:[%s1465_s0 + $0x28] sm:$0xff]  ;;  %v97_v24 = vld [vmem:[%s1466_s1 + $0x240] sm:$0xff]  ;;  %v846_v30 = vpack.c.bf16 %v146_v21, %v145_v20  ;;  %v115_v32 = vld [vmem:[%s1466_s1 + $0x2d0] sm:$0xff] }
  0x25   :  { %801 = vmatpush3.bf16.msra.mxu0 %v800_v49  ;;  %396 = vmatprep.mubr.f32.mxu0 %v20_v22  ;;  %v98_v27 = vld [vmem:[%s1466_s1 + $0x248] sm:$0xff]  ;;  %v129_v28 = vld [vmem:[%s1466_s1 + $0x340] sm:$0xff]  ;;  %v116_v33 = vld [vmem:[%s1466_s1 + $0x2d8] sm:$0xff] }
  0x26   :  { %327 = vmatmul.mubr.f32.vlgmr.msra.gmra.mrb[0].mxu1 %v17_v50  ;;  %803 = vmatprep.subr.bf16.mxu0 %v802_v52  ;;  %v130_v31 = vld [vmem:[%s1466_s1 + $0x348] sm:$0xff]  ;;  %v147_v34 = vld [vmem:[%s1466_s1 + $0x3d0] sm:$0xff]  ;;  %v148_v35 = vld [vmem:[%s1466_s1 + $0x3d8] sm:$0xff]  ;;  %v816_v36 = vpack.c.bf16 %v98_v27, %v97_v24  ;;  %v818_v38 = vpack.c.bf16 %v116_v33, %v115_v32 }
  0x27   :  { %833 = vmatpush3.bf16.msra.mxu1 %v832_v51  ;;  %466 = vmatprep.mubr.f32.mxu1 %v22_v29  ;;  %v848_v37 = vpack.c.bf16 %v130_v31, %v129_v28  ;;  %v99_v39 = vld [vmem:[%s1466_s1 + $0x250] sm:$0xff]  ;;  %v100_v40 = vld [vmem:[%s1466_s1 + $0x258] sm:$0xff]  ;;  %v850_v42 = vpack.c.bf16 %v148_v35, %v147_v34  ;;  %v117_v44 = vld [vmem:[%s1466_s1 + $0x2e0] sm:$0xff] }
  0x28   :  { %835 = vmatprep.subr.bf16.mxu1 %v834_v56  ;;  %v131_v41 = vld [vmem:[%s1466_s1 + $0x350] sm:$0xff]  ;;  %v132_v43 = vld [vmem:[%s1466_s1 + $0x358] sm:$0xff]  ;;  %v118_v45 = vld [vmem:[%s1466_s1 + $0x2e8] sm:$0xff]  ;;  %v820_v48 = vpack.c.bf16 %v100_v40, %v99_v39 }
  0x29   :  { %805 = vmatpush3.bf16.msra.mxu0 %v804_v62  ;;  %v149_v46 = vld [vmem:[%s1466_s1 + $0x3e0] sm:$0xff]  ;;  %v150_v47 = vld [vmem:[%s1466_s1 + $0x3e8] sm:$0xff]  ;;  %v852_v49 = vpack.c.bf16 %v132_v43, %v131_v41  ;;  %v822_v50 = vpack.c.bf16 %v118_v45, %v117_v44  ;;  %v119_v56 = vld [vmem:[%s1466_s1 + $0x2f0] sm:$0xff] }
  0x2a   :  { %807 = vmatprep.subr.bf16.mxu0 %v806_v0  ;;  %v101_v51 = vld [vmem:[%s1466_s1 + $0x260] sm:$0xff]  ;;  %v102_v52 = vld [vmem:[%s1466_s1 + $0x268] sm:$0xff]  ;;  %v854_v54 = vpack.c.bf16 %v150_v47, %v149_v46  ;;  %v120_v57 = vld [vmem:[%s1466_s1 + $0x2f8] sm:$0xff] }
  0x2b   :  { %837 = vmatpush3.bf16.msra.mxu1 %v836_v63  ;;  %v133_v53 = vld [vmem:[%s1466_s1 + $0x360] sm:$0xff]  ;;  %v134_v55 = vld [vmem:[%s1466_s1 + $0x368] sm:$0xff]  ;;  %v151_v58 = vld [vmem:[%s1466_s1 + $0x3f0] sm:$0xff]  ;;  %v824_v60 = vpack.c.bf16 %v102_v52, %v101_v51 }
  0x2c   :  { %839 = vmatprep.subr.bf16.mxu1 %v838_v4  ;;  %v152_v59 = vld [vmem:[%s1466_s1 + $0x3f8] sm:$0xff] }
  0x2d   :  { %809 = vmatpush3.bf16.msra.mxu0 %v808_v10 }
  0x2e   :  { %811 = vmatprep.subr.bf16.mxu0 %v810_v12 }
  0x2f   :  { %841 = vmatpush3.bf16.msra.mxu1 %v840_v11 }
  0x30   :  { %843 = vmatprep.subr.bf16.mxu1 %v842_v16 }
  0x31   :  { %813 = vmatpush3.bf16.msra.mxu0 %v812_v23 }
  0x32   :  { %815 = vmatprep.subr.bf16.mxu0 %v814_v26 }
  0x33   :  { %845 = vmatpush3.bf16.msra.mxu1 %v844_v25 }
  0x34   :  { %847 = vmatprep.subr.bf16.mxu1 %v846_v30 }
  0x35   :  { %817 = vmatpush3.bf16.msra.mxu0 %v816_v36 }
  0x36   :  { %819 = vmatprep.subr.bf16.mxu0 %v818_v38 }
  0x37   :  { %849 = vmatpush3.bf16.msra.mxu1 %v848_v37 }
  0x38   :  { %851 = vmatprep.subr.bf16.mxu1 %v850_v42 }
  0x39   :  { %821 = vmatpush3.bf16.msra.mxu0 %v820_v48 }
  0x3a   :  { %8 = vsyncpa [#allocation3], 0  ;;  %823 = vmatprep.subr.bf16.mxu0 %v822_v50  ;;  %v856_v61 = vpack.c.bf16 %v134_v55, %v133_v53  ;;  %v826_v62 = vpack.c.bf16 %v120_v57, %v119_v56  ;;  %v103_v63 = vld [vmem:[%s1466_s1 + $0x270] sm:$0xff]  ;;  %v104_v0 = vld [vmem:[%s1466_s1 + $0x278] sm:$0xff]  ;;  %v858_v2 = vpack.c.bf16 %v152_v59, %v151_v58  ;;  %vm542_vm0 = vcmask 523264  }
  0x3b   :  { %853 = vmatpush3.bf16.msra.mxu1 %v852_v49  ;;  %v135_v1 = vld [vmem:[%s1466_s1 + $0x370] sm:$0xff]  ;;  %v136_v3 = vld [vmem:[%s1466_s1 + $0x378] sm:$0xff]  ;;  %v169_v4 = vld [vmem:[%s1466_s1 + $0x480] sm:$0xff]  ;;  %v828_v6 = vpack.c.bf16 %v104_v0, %v103_v63 }
  0x3c   :  { %855 = vmatprep.subr.bf16.mxu1 %v854_v54  ;;  %v170_v5 = vld [vmem:[%s1466_s1 + $0x488] sm:$0xff]  ;;  %v860_v7 = vpack.c.bf16 %v136_v3, %v135_v1  ;;  %v153_v9 = vld [vmem:[%s1466_s1 + $0x400] sm:$0xff]  ;;  %v171_v11 = vld [vmem:[%s1466_s1 + $0x490] sm:$0xff] }
  0x3d   :  { %825 = vmatpush3.bf16.msra.mxu0 %v824_v60  ;;  %v862_v8 = vpack.c.bf16 %v170_v5, %v169_v4  ;;  %v154_v10 = vld [vmem:[%s1466_s1 + $0x408] sm:$0xff]  ;;  %v172_v12 = vld [vmem:[%s1466_s1 + $0x498] sm:$0xff]  ;;  %v19_v13 = vld [vmem:[%s1465_s0 + $0x20] sm:$0xff] }
  0x3e   :  { %827 = vmatprep.subr.bf16.mxu0 %v826_v62  ;;  %v864_v14 = vpack.c.bf16 %v154_v10, %v153_v9  ;;  %v21_v15 = vld [vmem:[%s1465_s0 + $0x30] sm:$0xff]  ;;  %v866_v16 = vpack.c.bf16 %v172_v12, %v171_v11  ;;  %v156_v18 = vld [vmem:[%s1466_s1 + $0x418] sm:$0xff]  ;;  %v173_v19 = vld [vmem:[%s1466_s1 + $0x4a0] sm:$0xff] }
  0x3f   :  { %857 = vmatpush3.bf16.msra.mxu1 %v856_v61  ;;  %v155_v17 = vld [vmem:[%s1466_s1 + $0x410] sm:$0xff]  ;;  %v174_v20 = vld [vmem:[%s1466_s1 + $0x4a8] sm:$0xff]  ;;  %v157_v24 = vld [vmem:[%s1466_s1 + $0x420] sm:$0xff] }
  0x40   :  { %859 = vmatprep.subr.bf16.mxu1 %v858_v2  ;;  %v24_v21 = vld [vmem:[%s1465_s0 + $0x48] sm:$0xff]  ;;  %v868_v22 = vpack.c.bf16 %v156_v18, %v155_v17  ;;  %v870_v23 = vpack.c.bf16 %v174_v20, %v173_v19  ;;  %v175_v26 = vld [vmem:[%s1466_s1 + $0x4b0] sm:$0xff]  ;;  %v176_v27 = vld [vmem:[%s1466_s1 + $0x4b8] sm:$0xff] }
  0x41   :  { %829 = vmatpush3.bf16.msra.mxu0 %v828_v6  ;;  %v158_v25 = vld [vmem:[%s1466_s1 + $0x428] sm:$0xff]  ;;  %v874_v29 = vpack.c.bf16 %v176_v27, %v175_v26  ;;  %v159_v30 = vld [vmem:[%s1466_s1 + $0x430] sm:$0xff]  ;;  %v160_v31 = vld [vmem:[%s1466_s1 + $0x438] sm:$0xff] }
  0x42   :  { %863 = vmatprep.subr.bf16.mxu0 %v862_v8  ;;  %v872_v28 = vpack.c.bf16 %v158_v25, %v157_v24  ;;  %v177_v32 = vld [vmem:[%s1466_s1 + $0x4c0] sm:$0xff]  ;;  %v178_v33 = vld [vmem:[%s1466_s1 + $0x4c8] sm:$0xff]  ;;  %v876_v34 = vpack.c.bf16 %v160_v31, %v159_v30  ;;  %v179_v38 = vld [vmem:[%s1466_s1 + $0x4d0] sm:$0xff] }
  0x43   :  { %861 = vmatpush3.bf16.msra.mxu1 %v860_v7  ;;  %v878_v35 = vpack.c.bf16 %v178_v33, %v177_v32  ;;  %v161_v36 = vld [vmem:[%s1466_s1 + $0x440] sm:$0xff]  ;;  %v162_v37 = vld [vmem:[%s1466_s1 + $0x448] sm:$0xff]  ;;  %v180_v39 = vld [vmem:[%s1466_s1 + $0x4d8] sm:$0xff] }
  0x44   :  { %397 = vmatmul.mubr.f32.vlgmr.msra.gmra.mrb[2].mxu0 %v19_v13  ;;  %v880_v40 = vpack.c.bf16 %v162_v37, %v161_v36  ;;  %v882_v41 = vpack.c.bf16 %v180_v39, %v179_v38  ;;  %v163_v42 = vld [vmem:[%s1466_s1 + $0x450] sm:$0xff]  ;;  %v164_v43 = vld [vmem:[%s1466_s1 + $0x458] sm:$0xff]  ;;  %v181_v44 = vld [vmem:[%s1466_s1 + $0x4e0] sm:$0xff] }
  0x45   :  { %865 = vmatpush3.bf16.msra.mxu0 %v864_v14  ;;  %536 = vmatprep.mubr.f32.mxu0 %v24_v21  ;;  %v182_v45 = vld [vmem:[%s1466_s1 + $0x4e8] sm:$0xff]  ;;  %v884_v46 = vpack.c.bf16 %v164_v43, %v163_v42  ;;  %v165_v48 = vld [vmem:[%s1466_s1 + $0x460] sm:$0xff]  ;;  %v183_v50 = vld [vmem:[%s1466_s1 + $0x4f0] sm:$0xff] }
  0x46   :  { %467 = vmatmul.mubr.f32.vlgmr.msra.gmra.mrb[2].mxu1 %v21_v15  ;;  %867 = vmatprep.subr.bf16.mxu0 %v866_v16  ;;  %v886_v47 = vpack.c.bf16 %v182_v45, %v181_v44  ;;  %v166_v49 = vld [vmem:[%s1466_s1 + $0x468] sm:$0xff]  ;;  %v184_v51 = vld [vmem:[%s1466_s1 + $0x4f8] sm:$0xff]  ;;  %v167_v54 = vld [vmem:[%s1466_s1 + $0x470] sm:$0xff] }
  0x47   :  { %v888_v52 = vpack.c.bf16 %v166_v49, %v165_v48  ;;  %v890_v53 = vpack.c.bf16 %v184_v51, %v183_v50  ;;  %v168_v55 = vld [vmem:[%s1466_s1 + $0x478] sm:$0xff]  ;;  %v23_v57 = vld [vmem:[%s1465_s0 + $0x40] sm:$0xff]  ;;  %s919_s0 = smov [#allocation2]  }
  0x48   :  { %v892_v56 = vpack.c.bf16 %v168_v55, %v167_v54  ;;  %v558_v59 = vld [vmem:[%s1467_s2] ss:$0 sm:$0xff]  ;;  %s550_s1 = sshll.u32 %s919_s0, 4  ;;  %s551_s1 = int_to_ptr.vmem [resolvable:$true] %s550_s1 }
  0x49   :  { %869 = vmatpush3.bf16.msra.mxu0 %v868_v22  ;;  %s895_s2 = scalar_lea.vmem %s551_s1, 128  ;;  %p900_p1 = scmp.lt.s32.totalorder %s551_s1, %s551_s1 }
  0x4a   :  { %871 = vmatprep.subr.bf16.mxu0 %v870_v23  ;;  %p896_p0 = scmp.ne.s32.totalorder %s551_s1, %s895_s2  ;;  %p901_p2 = scmp.lt.s32.totalorder %s895_s2, %s895_s2 }
  0x4c   :  { %p902_p3 = por %p901_p2, %p900_p1 }
  0x4d   :  { %873 = vmatpush3.bf16.msra.mxu0 %v872_v28 }
  0x4e   :  { %875 = vmatprep.subr.bf16.mxu0 %v874_v29  ;;  %p903_p4 = pnand %p902_p3, %p896_p0 }
  0x51   :  { %877 = vmatpush3.bf16.msra.mxu0 %v876_v34 }
  0x52   :  { %879 = vmatprep.subr.bf16.mxu0 %v878_v35 }
  0x55   :  { %881 = vmatpush3.bf16.msra.mxu0 %v880_v40 }
  0x56   :  { %883 = vmatprep.subr.bf16.mxu0 %v882_v41 }
  0x59   :  { %885 = vmatpush3.bf16.msra.mxu0 %v884_v46 }
  0x5a   :  { %887 = vmatprep.subr.bf16.mxu0 %v886_v47 }
  0x5d   :  { %889 = vmatpush3.bf16.msra.mxu0 %v888_v52 }
  0x5e   :  { %891 = vmatprep.subr.bf16.mxu0 %v890_v53 }
  0x61   :  { %893 = vmatpush3.bf16.msra.mxu0 %v892_v56 }
  0x64   :  { %537 = vmatmul.mubr.f32.vlgmr.msra.gmra.mrb[4].mxu0 %v23_v57 }
  0xf7   :  { %v591_v58 = vpop.f32.mrb[0].mxu0 }
  0xf8   :  { %v592_v60 = vpop.f32.mrb[1].mxu0 }
  0xf9   :  { %v626_v61 = vpop.f32.mrb[0].mxu1  ;;  %v593_v62 = vadd.f32 %v592_v60, %v591_v58 }
  0xfa   :  { %v627_v63 = vpop.f32.mrb[1].mxu1 }
  0xfb   :  { %v628_v0 = vadd.f32 %v627_v63, %v626_v61  ;;  %v259_v1 = vadd.f32 %v593_v62, %v558_v59 }
  0xfd   :  { %v329_v2 = vadd.f32 %v628_v0, %v259_v1 }
 0x117   :  { %v661_v3 = vpop.f32.mrb[2].mxu0 }
 0x118   :  { %v662_v4 = vpop.f32.mrb[3].mxu0 }
 0x119   :  { %v696_v5 = vpop.f32.mrb[2].mxu1  ;;  %v663_v6 = vadd.f32 %v662_v4, %v661_v3 }
 0x11a   :  { %v697_v7 = vpop.f32.mrb[3].mxu1 }
 0x11b   :  { %v698_v8 = vadd.f32 %v697_v7, %v696_v5  ;;  %v399_v9 = vadd.f32 %v663_v6, %v329_v2 }
 0x11d   :  { %v469_v10 = vadd.f32 %v698_v8, %v399_v9 }
 0x137   :  { %v731_v11 = vpop.f32.mrb[4].mxu0 }
 0x138   :  { %v732_v12 = vpop.f32.mrb[5].mxu0 }
 0x139   :  { %v733_v13 = vadd.f32 %v732_v12, %v731_v11 }
 0x13b   :  { %v539_v14 = vadd.f32 %v733_v13, %v469_v10 }
 0x13d   :  { %543 = vst.msk [vmem:[#allocation2] sm:$0xff] %vm542_vm0, %v539_v14 }
 0x13e   :  { %906 = shalt.err (!%p903_p4)
}
 0x13f   :  { %s907_s5 = scalar_lea.hbm %s1468_s3, 128 }
 0x140   :  { %p908_p5 = scmp.ne.s32.totalorder %s1468_s3, %s907_s5  ;;  %p911_p6 = scmp.lt.u32.totalorder %s907_s5, %s1468_s3 }
 0x142   :  { %p913_p7 = pnand %p911_p6, %p908_p5 }
 0x144   :  { %916 = shalt.err (!%p913_p7)
}
 0x145   :  { %553 = dma.vmem_to_hbm [thread:$0]  %s551_s1, 128, %s1468_s3, [#allocation3]  }
 0x146   :  { %917 = dma.done.wait [#allocation3], 128  }
 0x147   :  { %918 = vsyncadd [#allocation3], 4294967168 }
 0x148   :  { %557 = vsyncpa [#allocation3], 1 }

</bundles_post_ra>
